<compile_context>
chip_gen: v5e
topology: v5e:2x2
jax: 0.10.0
libtpu: 0.0.40
codegen_flags: <defaults>
</compile_context>

<pallas_src>
import jax
import jax.numpy as jnp
from jax import lax
from jax.experimental import pallas as pl
from jax.experimental.pallas import tpu as pltpu


def _conv_accum_kernel(x_ref, w_ref, o_ref, acc_ref):
    # x_ref: (1, 1, K9, TM)   im2col slab for time slice (t + kd), spatial tile m
    # w_ref: (KD, Cout, K9)   full folded weight, resident in VMEM
    # o_ref: (1, 1, Cout, TM) conv output tile (channels x flattened spatial)
    # acc_ref: (Cout, TM)     f32 accumulator across the kd reduction axis
    kd = pl.program_id(3)

    @pl.when(kd == 0)
    def _():
        acc_ref[...] = jnp.zeros_like(acc_ref)

    acc_ref[...] += jnp.dot(w_ref[kd], x_ref[0, 0],
                            preferred_element_type=jnp.float32)

    @pl.when(kd == pl.num_programs(3) - 1)
    def _():
        o_ref[0, 0] = acc_ref[...].astype(o_ref.dtype)


@jax.jit
def downsample_forward(x_ncthw, weight):
    """Pallas equivalent of Downsample.forward.

    x_ncthw: (N, Cin, T, H, W)
    weight:  (Cout, Cin, 3, 3, 3) with Cout = dim_out // 4
    returns: (N, 4*Cout, T, H//2, W//2)
    """
    N, Cin, T, H, W = x_ncthw.shape
    Cout, Cin_w, KD, KH, KW = weight.shape
    assert Cin_w == Cin and (KD, KH, KW) == (3, 3, 3)
    assert H % 2 == 0 and W % 2 == 0

    f32 = jnp.float32
    x = x_ncthw.astype(f32)
    w = weight.astype(f32)

    # ---- glue: zero pad + fold (kh, kw, cin) into the contraction dim (im2col) ----
    xpad = jnp.pad(x, ((0, 0), (0, 0), (1, 1), (1, 1), (1, 1)))   # (N,Cin,Tp,Hp,Wp)
    Tp = T + 2
    K9 = KH * KW * Cin
    M = H * W
    slabs = [xpad[:, :, :, kh:kh + H, kw:kw + W]                   # (N,Cin,Tp,H,W)
             for kh in range(KH) for kw in range(KW)]
    xf = jnp.stack(slabs, axis=0).reshape(KH, KW, N, Cin, Tp, H, W)
    # -> (N, Tp, KH, KW, Cin, H, W) -> (N, Tp, K9, M);  K index = (kh*KW + kw)*Cin + ci
    xf = jnp.transpose(xf, (2, 4, 0, 1, 3, 5, 6)).reshape(N, Tp, K9, M)

    # weight -> (KD, Cout, K9) with the same (kh, kw, cin) ordering on K.
    wf = jnp.transpose(w, (2, 0, 3, 4, 1)).reshape(KD, Cout, K9)

    # ---- spatial tiling of M: lane-dense tiles, no halo needed after im2col ----
    if M % 256 == 0:
        TM = 256
    elif M % 128 == 0:
        TM = 128
    else:
        TM = M
    nM = M // TM

    out = pl.pallas_call(
        _conv_accum_kernel,
        out_shape=jax.ShapeDtypeStruct((N, T, Cout, M), f32),
        grid_spec=pltpu.PrefetchScalarGridSpec(
            num_scalar_prefetch=0,
            grid=(N, T, nM, KD),
            in_specs=[
                pl.BlockSpec((1, 1, K9, TM), lambda n, t, m, kd: (n, t + kd, 0, m)),
                pl.BlockSpec((KD, Cout, K9), lambda n, t, m, kd: (0, 0, 0)),
            ],
            out_specs=pl.BlockSpec((1, 1, Cout, TM),
                                   lambda n, t, m, kd: (n, t, 0, m)),
            scratch_shapes=[pltpu.VMEM((Cout, TM), jnp.float32)],
        ),
        compiler_params=pltpu.CompilerParams(
            dimension_semantics=("parallel", "parallel", "parallel", "arbitrary"),
            vmem_limit_bytes=64 * 1024 * 1024,
        ),
    )(xf, wf)

    # ---- glue: pixel-unshuffle (rh=rw=2) + back to PyTorch NCDHW layout ----
    Hh, Wh = H // 2, W // 2
    y = out.reshape(N, T, Cout, Hh, 2, Wh, 2)          # (n, t, c, hh, rh, ww, rw)
    y = jnp.transpose(y, (0, 2, 4, 6, 1, 3, 5))        # (n, c, rh, rw, t, hh, ww)
    return y.reshape(N, Cout * 4, T, Hh, Wh)


def _reference(x, weight):
    # Pure-JAX reference: XLA conv3d + the same einops rearrange.
    conv = lax.conv_general_dilated(
        x, weight, window_strides=(1, 1, 1),
        padding=((1, 1), (1, 1), (1, 1)),
        dimension_numbers=("NCDHW", "OIDHW", "NCDHW"))
    N, C, T, H, W = conv.shape
    r = conv.reshape(N, C, T, H // 2, 2, W // 2, 2)
    r = jnp.transpose(r, (0, 1, 4, 6, 2, 3, 5))
    return r.reshape(N, C * 4, T, H // 2, W // 2)


if __name__ == "__main__":
    # Downsample(dim_in, dim_out) with typical TMT-style dims.
    dim_in, dim_out = 48, 96
    Cout = dim_out // 4                       # conv channels before pixel-unshuffle
    N, T, H, W = 2, 4, 16, 32                 # small deterministic example

    key = jax.random.PRNGKey(0)
    kx, kw_key = jax.random.split(key)
    x = jax.random.normal(kx, (N, dim_in, T, H, W), dtype=jnp.float32)
    weight = 0.02 * jax.random.normal(
        kw_key, (Cout, dim_in, 3, 3, 3), dtype=jnp.float32)

    out = jax.block_until_ready(downsample_forward(x, weight))
    ref = jax.block_until_ready(_reference(x, weight))

    assert out.shape == ref.shape == (N, dim_out, T, H // 2, W // 2)
    assert jnp.allclose(out, ref, atol=5e-4, rtol=5e-4), "mismatch vs XLA conv3d+rearrange"

    print("KERNEL_OK")
</pallas_src>

<mosaic_0001>
module attributes {stable_mosaic.version = 11 : i64} {
  func.func @_conv_accum_kernel(%arg0: i32, %arg1: i32, %arg2: i32, %arg3: i32, %arg4: memref<1x1x432x256xf32, #tpu.memory_space<vmem>>, %arg5: memref<3x24x432xf32, #tpu.memory_space<vmem>>, %arg6: memref<1x1x24x256xf32, #tpu.memory_space<vmem>>, %arg7: memref<24x256xf32, #tpu.memory_space<vmem>>) attributes {dimension_semantics = [#tpu.dimension_semantics<parallel>, #tpu.dimension_semantics<parallel>, #tpu.dimension_semantics<parallel>, #tpu.dimension_semantics<arbitrary>], iteration_bounds = array<i64: 2, 4, 2, 3>, scalar_prefetch = 0 : i64, scratch_operands = 1 : i64, tpu.core_type = #tpu.core_type<tc>, window_params = [{transform_indices = @transform_0, window_bounds = array<i64: 1, 1, 432, 256>}, {pipeline_mode = #tpu.pipeline_mode<synchronous>, transform_indices = @transform_1, window_bounds = array<i64: 3, 24, 432>}, {transform_indices = @transform_2, window_bounds = array<i64: 1, 1, 24, 256>}]} {
    %c0_i32 = arith.constant 0 : i32
    %0 = arith.cmpi eq, %arg3, %c0_i32 : i32
    %1 = arith.extui %0 : i1 to i32
    %c0_i32_0 = arith.constant 0 : i32
    %2 = arith.cmpi ne, %1, %c0_i32_0 : i32
    scf.if %2 {
      %cst_11 = arith.constant 0.000000e+00 : f32
      %15 = vector.broadcast %cst_11 : f32 to vector<24x256xf32>
      %c0_12 = arith.constant 0 : index
      %c0_13 = arith.constant 0 : index
      %16 = vector.load %arg7[%c0_12, %c0_13] : memref<24x256xf32, #tpu.memory_space<vmem>>, vector<24x256xf32>
      tpu.vector_store %arg7[%c0_12, %c0_13], %15 {strides = array<i32>} : memref<24x256xf32, #tpu.memory_space<vmem>>, vector<24x256xf32>,
    } else {
    }
    %c0 = arith.constant 0 : index
    %c0_1 = arith.constant 0 : index
    %3 = vector.load %arg7[%c0, %c0_1] : memref<24x256xf32, #tpu.memory_space<vmem>>, vector<24x256xf32>
    %4 = arith.index_cast %arg3 : i32 to index
    %c0_2 = arith.constant 0 : index
    %c0_3 = arith.constant 0 : index
    %5 = vector.load %arg5[%4, %c0_2, %c0_3] : memref<3x24x432xf32, #tpu.memory_space<vmem>>, vector<1x24x432xf32>
    %6 = vector.shape_cast %5 : vector<1x24x432xf32> to vector<24x432xf32>
    %c0_4 = arith.constant 0 : index
    %c0_5 = arith.constant 0 : index
    %c0_6 = arith.constant 0 : index
    %c0_7 = arith.constant 0 : index
    %7 = vector.load %arg4[%c0_4, %c0_5, %c0_6, %c0_7] : memref<1x1x432x256xf32, #tpu.memory_space<vmem>>, vector<1x1x432x256xf32>
    %8 = vector.shape_cast %7 : vector<1x1x432x256xf32> to vector<432x256xf32>
    %cst = arith.constant dense<0.000000e+00> : vector<24x256xf32>
    %9 = tpu.matmul %6, %8, %cst {dimension_numbers = #tpu.dot_dimension_numbers<[1], [0], [0], [1], [0, 0, 1, 1], [], []>} : vector<24x432xf32>, vector<432x256xf32>, vector<24x256xf32> -> vector<24x256xf32>
    %10 = arith.addf %3, %9 : vector<24x256xf32>
    %c0_8 = arith.constant 0 : index
    %c0_9 = arith.constant 0 : index
    %11 = vector.load %arg7[%c0_8, %c0_9] : memref<24x256xf32, #tpu.memory_space<vmem>>, vector<24x256xf32>
    tpu.vector_store %arg7[%c0_8, %c0_9], %10 {strides = array<i32>} : memref<24x256xf32, #tpu.memory_space<vmem>>, vector<24x256xf32>,
    %c2_i32 = arith.constant 2 : i32
    %12 = arith.cmpi eq, %arg3, %c2_i32 : i32
    %13 = arith.extui %12 : i1 to i32
    %c0_i32_10 = arith.constant 0 : i32
    %14 = arith.cmpi ne, %13, %c0_i32_10 : i32
    scf.if %14 {
      %c0_11 = arith.constant 0 : index
      %c0_12 = arith.constant 0 : index
      %15 = vector.load %arg7[%c0_11, %c0_12] : memref<24x256xf32, #tpu.memory_space<vmem>>, vector<24x256xf32>
      %c0_13 = arith.constant 0 : index
      %c0_14 = arith.constant 0 : index
      %c0_15 = arith.constant 0 : index
      %c0_16 = arith.constant 0 : index
      %16 = vector.load %arg6[%c0_13, %c0_14, %c0_15, %c0_16] : memref<1x1x24x256xf32, #tpu.memory_space<vmem>>, vector<1x1x24x256xf32>
      %17 = vector.shape_cast %16 : vector<1x1x24x256xf32> to vector<24x256xf32>
      %18 = vector.shape_cast %15 : vector<24x256xf32> to vector<1x1x24x256xf32>
      tpu.vector_store %arg6[%c0_13, %c0_14, %c0_15, %c0_16], %18 {strides = array<i32>} : memref<1x1x24x256xf32, #tpu.memory_space<vmem>>, vector<1x1x24x256xf32>,
    } else {
    }
    return
  }
  func.func @transform_0(%arg0: i32, %arg1: i32, %arg2: i32, %arg3: i32) -> (i32, i32, i32, i32) {
    %0 = arith.addi %arg1, %arg3 : i32
    %c0_i32 = arith.constant 0 : i32
    %c0_i32_0 = arith.constant 0 : i32
    return %arg0, %0, %c0_i32, %arg2 : i32, i32, i32, i32
  }
  func.func @transform_1(%arg0: i32, %arg1: i32, %arg2: i32, %arg3: i32) -> (i32, i32, i32) {
    %c0_i32 = arith.constant 0 : i32
    %c0_i32_0 = arith.constant 0 : i32
    %c0_i32_1 = arith.constant 0 : i32
    %c0_i32_2 = arith.constant 0 : i32
    return %c0_i32, %c0_i32_0, %c0_i32_1 : i32, i32, i32
  }
  func.func @transform_2(%arg0: i32, %arg1: i32, %arg2: i32, %arg3: i32) -> (i32, i32, i32, i32) {
    %c0_i32 = arith.constant 0 : i32
    %c0_i32_0 = arith.constant 0 : i32
    return %arg0, %arg1, %c0_i32, %arg2 : i32, i32, i32, i32
  }
}

</mosaic_0001>

<bundles_post_ra>
// kernel: downsample_forward.1
= control target key start
LH: loop header
LB: loop body
LE: loop exit
PB: predicated region body
PF: predicated region fallthrough
CT: control target
= control target key end

     0   :  { %s1780_s0 = inlined_call_operand.vmem [shape: f32[2,6,432,512], index: 0, kind: input, shape index: {}]   ;;  %s1781_s1 = inlined_call_operand.vmem [shape: f32[3,24,432], index: 1, kind: input, shape index: {}]   ;;  %s1782_s2 = inlined_call_operand.vmem [shape: f32[2,4,24,512], index: 2, kind: output, shape index: {}]  }
   0x1   :  { %1786 = sst [smem:[#allocation9_spill]] %s1782_s2 }
   0x2   :  { %s1188_s9 = smov 0   ;;  %s1190_s10 = smov 0  }
   0x3   :  { %s1192_s11 = smov 0   ;;  %s1194_s12 = smov 0  }
   0x4   :  { %s1196_s13 = smov 0   ;;  %s1198_s14 = smov 0  }
   0x5   :  { %s1200_s15 = smov 0   ;;  %s1202_s16 = smov 0  }
   0x6   :  { %s1204_s17 = smov 0   ;;  %s1206_s18 = smov 0  }
   0x7   :  { %s1208_s19 = smov 0   ;;  %s1210_s20 = smov 0  }
   0x8   :  { %s1212_s21 = smov 0  }
   0x9 LB: > { %1787 = sst [smem:[#allocation5_spill]] %s1150_s16  ;;  %s27_s22 = sadd.s32 1, %s1154_s17  ;;  %s1170_s21 = sphi %s1212_s21, %s12_s21   ;;  %s1166_s20 = sphi %s1210_s20, %s1809_s20   ;;  %s1162_s19 = sphi %s1208_s19, %s1808_s19   ;;  %s1158_s18 = sphi %s1206_s18, %s1807_s18   ;;  %s1154_s17 = sphi %s1204_s17, %s1797_s17   ;;  %s1150_s16 = sphi %s1202_s16, %s1806_s16   ;;  %s1146_s15 = sphi %s1200_s15, %s1805_s15   ;;  %s1142_s14 = sphi %s1198_s14, %s1804_s14   ;;  %s1138_s13 = sphi %s1196_s13, %s1796_s13   ;;  %s1134_s12 = sphi %s1194_s12, %s1803_s12   ;;  %s1130_s11 = sphi %s1192_s11, %s1802_s11   ;;  %s1126_s10 = sphi %s1190_s10, %s1801_s10   ;;  %s1122_s9 = sphi %s1188_s9, %s1800_s9  }
   0xa   : > { %1788 = sst [smem:[#allocation6_spill]] %s1154_s17  ;;  %p28_p0 = scmp.ge.s32.totalorder %s27_s22, 3 }
   0xb   : > { %s30_s23 = sadd.s32 1, %s1158_s18  ;;  %s34_s24 = sadd.s32 1, %s1162_s19 }
   0xc   : > { %s1811_s23 = smov (!%p28_p0, %s30_s23), %s1158_s18  ;;  %s1813_s22 = smov (%p28_p0, %s27_s22), 0 }
   0xd   : > { %1789 = sst [smem:[#allocation7_spill]] %s1813_s22  ;;  %p32_p1 = scmp.ge.s32.totalorder %s1811_s23, 2 }
   0xe   : > { %p58_p2 = scmp.ne.s32.totalorder %s1134_s12, %s1130_s11  ;;  %s935_s25 = sadd.s32 4294967295, %s1170_s21  }
   0xf   : > { %p59_p3 = scmp.eq.s32.totalorder %s1170_s21, 0  ;;  %s1815_s23 = smov (%p32_p1, %s1811_s23), 0 }
  0x10   : > { %s1817_s24 = smov (!%p32_p1, %s34_s24), %s1162_s19  ;;  %s38_s26 = sadd.s32 1, %s1166_s20 }
  0x11   : > { %p1267_p4 = por %p59_p3, %p58_p2  ;;  %p36_p5 = scmp.ge.s32.totalorder %s1817_s24, 4 }
  0x12   : > { %s1273_s28 = sadd.s32 %s1154_s17, %s1162_s19  ;;  %p112_p6 = scmp.ne.s32.totalorder %s1126_s10, %s1122_s9 }
  0x13   : > { %p113_p7 = scmp.eq.s32.totalorder %s935_s25, 47  ;;  %s1819_s24 = smov (%p36_p5, %s1817_s24), 0 }
  0x14   : > { %s1821_s26 = smov (!%p36_p5, %s38_s26), %s1166_s20  ;;  %s43_s29 = sadd.s32 %s1819_s24, %s1813_s22 }
  0x15   : > { %p40_p8 = scmp.ge.s32.totalorder %s1821_s26, 2  ;;  %s96_s30 = ssub.s32 %s1162_s19, %s1819_s24 }
  0x16   : > { %s45_s3 = ssub.s32 %s1273_s28, %s43_s29  ;;  %p1285_p9 = por %p113_p7, %p112_p6 }
  0x17   : > { %s1823_s26 = smov (%p40_p8, %s1821_s26), 0  ;;  %s47_s5 = ssub.s32 %s1158_s18, %s1815_s23 }
  0x18   : > { %1792 = sst [smem:[#allocation8_spill]] %s1823_s26  ;;  %s51_s6 = sadd.s32 1, %s1134_s12 }
  0x19   : > { %s44_s7 = ssub.s32 %s1166_s20, %s1823_s26  ;;  %s102_s8 = sadd.s32 1, %s1126_s10 }
  0x1a   : > { %s46_s25 = sor.u32 %s45_s3, %s44_s7  ;;  %s97_s17 = sor.u32 %s96_s30, %s44_s7 }
  0x1b   : > { %s48_s2 = sor.u32 %s47_s5, %s46_s25  ;;  %s99_s22 = sor.u32 %s97_s17, %s47_s5 }
  0x1c   : > { %p49_p10 = scmp.eq.s32.totalorder %s48_s2, 0  ;;  %p100_p11 = scmp.eq.s32.totalorder %s99_s22, 0 }
  0x1d   : > { %p938_p12 = scmp.ge.s32.totalorder %s1170_s21, 48 }
  0x1e   : > { %s1298_s16 = scalar_select %p49_p10, %s1134_s12, %s51_s6  }
  0x1f   : > { %s1301_s29 = scalar_select %p100_p11, %s1126_s10, %s102_s8  }
  0x20   : > { %138 = sbr.rel (%p938_p12) target bundleno = 154 (0x9a), region = 20 }
  0x25   : > { %141 = sbr.rel (!%p1267_p4) target bundleno = 154 (0x9a), region = 24  ;;  %s143_s3 = sand.u32 (%p1267_p4), 1, %s1134_s12  }
  0x26   : > { %s956_s30 = smul.u32 (%p1267_p4), 864, %s143_s3  ;;  %s939_s7 = sshll.u32 (%p1267_p4), %s1158_s18, 1 }
  0x27   : > { %s957_s17 = smul.u32 (%p1267_p4), 216, %s1273_s28 }
  0x28   : > { %s958_s2 = smul.u32 (%p1267_p4), 1296, %s1166_s20  ;;  %s1318_s27 = scalar_lea.vmem (%p1267_p4), [#allocation3], %s956_s30 }
  0x29   : > { %s149_s22 = sadd.s32 (%p1267_p4), %s957_s17, %s939_s7 }
  0x2a   : > { %s151_s5 = sadd.s32 %s958_s2, %s149_s22 }
  0x2b   : > { %s940_s6 = sshll.u32 %s151_s5, 3 }
  0x2c   : > { %s1313_s26 = scalar_lea.vmem %s1780_s0, %s940_s6 }
  0x2d   : > { %v166_v0 = vld [vmem:[%s1313_s26] sm:$0xff]  ;;  %v168_v1 = vld [vmem:[%s1313_s26 + $0x8] sm:$0xff] }
  0x2e   : > { %v170_v2 = vld [vmem:[%s1313_s26 + $0x20] sm:$0xff]  ;;  %167 = vst [vmem:[%s1318_s27] sm:$0xff] %v166_v0  ;;  %v172_v3 = vld [vmem:[%s1313_s26 + $0x28] sm:$0xff] }
  0x2f   : > { %169 = vst [vmem:[%s1318_s27 + $0x8] sm:$0xff] %v168_v1  ;;  %v174_v4 = vld [vmem:[%s1313_s26 + $0x40] sm:$0xff]  ;;  %v176_v5 = vld [vmem:[%s1313_s26 + $0x48] sm:$0xff] }
  0x30   : > { %171 = vst [vmem:[%s1318_s27 + $0x10] sm:$0xff] %v170_v2  ;;  %v178_v6 = vld [vmem:[%s1313_s26 + $0x60] sm:$0xff]  ;;  %v180_v7 = vld [vmem:[%s1313_s26 + $0x68] sm:$0xff] }
  0x31   : > { %173 = vst [vmem:[%s1318_s27 + $0x18] sm:$0xff] %v172_v3  ;;  %v182_v8 = vld [vmem:[%s1313_s26 + $0x80] sm:$0xff]  ;;  %v184_v9 = vld [vmem:[%s1313_s26 + $0x88] sm:$0xff] }
  0x32   : > { %175 = vst [vmem:[%s1318_s27 + $0x20] sm:$0xff] %v174_v4  ;;  %v186_v10 = vld [vmem:[%s1313_s26 + $0xa0] sm:$0xff]  ;;  %v188_v11 = vld [vmem:[%s1313_s26 + $0xa8] sm:$0xff] }
  0x33   : > { %177 = vst [vmem:[%s1318_s27 + $0x28] sm:$0xff] %v176_v5  ;;  %v190_v12 = vld [vmem:[%s1313_s26 + $0xc0] sm:$0xff]  ;;  %v192_v13 = vld [vmem:[%s1313_s26 + $0xc8] sm:$0xff] }
  0x34   : > { %179 = vst [vmem:[%s1318_s27 + $0x30] sm:$0xff] %v178_v6  ;;  %v194_v14 = vld [vmem:[%s1313_s26 + $0xe0] sm:$0xff]  ;;  %v196_v15 = vld [vmem:[%s1313_s26 + $0xe8] sm:$0xff] }
  0x35   : > { %181 = vst [vmem:[%s1318_s27 + $0x38] sm:$0xff] %v180_v7  ;;  %v198_v16 = vld [vmem:[%s1313_s26 + $0x100] sm:$0xff]  ;;  %v200_v17 = vld [vmem:[%s1313_s26 + $0x108] sm:$0xff] }
  0x36   : > { %183 = vst [vmem:[%s1318_s27 + $0x40] sm:$0xff] %v182_v8  ;;  %v202_v18 = vld [vmem:[%s1313_s26 + $0x120] sm:$0xff]  ;;  %v204_v19 = vld [vmem:[%s1313_s26 + $0x128] sm:$0xff] }
  0x37   : > { %185 = vst [vmem:[%s1318_s27 + $0x48] sm:$0xff] %v184_v9  ;;  %v206_v20 = vld [vmem:[%s1313_s26 + $0x140] sm:$0xff]  ;;  %v208_v21 = vld [vmem:[%s1313_s26 + $0x148] sm:$0xff] }
  0x38   : > { %187 = vst [vmem:[%s1318_s27 + $0x50] sm:$0xff] %v186_v10  ;;  %v210_v22 = vld [vmem:[%s1313_s26 + $0x160] sm:$0xff]  ;;  %v212_v23 = vld [vmem:[%s1313_s26 + $0x168] sm:$0xff] }
  0x39   : > { %189 = vst [vmem:[%s1318_s27 + $0x58] sm:$0xff] %v188_v11  ;;  %v214_v24 = vld [vmem:[%s1313_s26 + $0x180] sm:$0xff]  ;;  %v216_v25 = vld [vmem:[%s1313_s26 + $0x188] sm:$0xff] }
  0x3a   : > { %191 = vst [vmem:[%s1318_s27 + $0x60] sm:$0xff] %v190_v12  ;;  %v218_v26 = vld [vmem:[%s1313_s26 + $0x1a0] sm:$0xff]  ;;  %v220_v27 = vld [vmem:[%s1313_s26 + $0x1a8] sm:$0xff] }
  0x3b   : > { %193 = vst [vmem:[%s1318_s27 + $0x68] sm:$0xff] %v192_v13  ;;  %v222_v28 = vld [vmem:[%s1313_s26 + $0x1c0] sm:$0xff]  ;;  %v224_v29 = vld [vmem:[%s1313_s26 + $0x1c8] sm:$0xff] }
  0x3c   : > { %195 = vst [vmem:[%s1318_s27 + $0x70] sm:$0xff] %v194_v14  ;;  %v226_v30 = vld [vmem:[%s1313_s26 + $0x1e0] sm:$0xff]  ;;  %v228_v31 = vld [vmem:[%s1313_s26 + $0x1e8] sm:$0xff] }
  0x3d   : > { %197 = vst [vmem:[%s1318_s27 + $0x78] sm:$0xff] %v196_v15  ;;  %v230_v32 = vld [vmem:[%s1313_s26 + $0x200] sm:$0xff]  ;;  %v232_v33 = vld [vmem:[%s1313_s26 + $0x208] sm:$0xff] }
  0x3e   : > { %199 = vst [vmem:[%s1318_s27 + $0x80] sm:$0xff] %v198_v16  ;;  %v234_v34 = vld [vmem:[%s1313_s26 + $0x220] sm:$0xff]  ;;  %v236_v35 = vld [vmem:[%s1313_s26 + $0x228] sm:$0xff] }
  0x3f   : > { %201 = vst [vmem:[%s1318_s27 + $0x88] sm:$0xff] %v200_v17  ;;  %v238_v36 = vld [vmem:[%s1313_s26 + $0x240] sm:$0xff]  ;;  %v240_v37 = vld [vmem:[%s1313_s26 + $0x248] sm:$0xff] }
  0x40   : > { %203 = vst [vmem:[%s1318_s27 + $0x90] sm:$0xff] %v202_v18  ;;  %v242_v38 = vld [vmem:[%s1313_s26 + $0x260] sm:$0xff]  ;;  %v244_v39 = vld [vmem:[%s1313_s26 + $0x268] sm:$0xff] }
  0x41   : > { %205 = vst [vmem:[%s1318_s27 + $0x98] sm:$0xff] %v204_v19  ;;  %v246_v40 = vld [vmem:[%s1313_s26 + $0x280] sm:$0xff]  ;;  %v248_v41 = vld [vmem:[%s1313_s26 + $0x288] sm:$0xff] }
  0x42   : > { %207 = vst [vmem:[%s1318_s27 + $0xa0] sm:$0xff] %v206_v20  ;;  %v250_v42 = vld [vmem:[%s1313_s26 + $0x2a0] sm:$0xff]  ;;  %v252_v43 = vld [vmem:[%s1313_s26 + $0x2a8] sm:$0xff] }
  0x43   : > { %209 = vst [vmem:[%s1318_s27 + $0xa8] sm:$0xff] %v208_v21  ;;  %v254_v44 = vld [vmem:[%s1313_s26 + $0x2c0] sm:$0xff]  ;;  %v256_v45 = vld [vmem:[%s1313_s26 + $0x2c8] sm:$0xff] }
  0x44   : > { %211 = vst [vmem:[%s1318_s27 + $0xb0] sm:$0xff] %v210_v22  ;;  %v258_v46 = vld [vmem:[%s1313_s26 + $0x2e0] sm:$0xff]  ;;  %v260_v47 = vld [vmem:[%s1313_s26 + $0x2e8] sm:$0xff] }
  0x45   : > { %213 = vst [vmem:[%s1318_s27 + $0xb8] sm:$0xff] %v212_v23  ;;  %v262_v48 = vld [vmem:[%s1313_s26 + $0x300] sm:$0xff]  ;;  %v264_v49 = vld [vmem:[%s1313_s26 + $0x308] sm:$0xff] }
  0x46   : > { %215 = vst [vmem:[%s1318_s27 + $0xc0] sm:$0xff] %v214_v24  ;;  %v266_v50 = vld [vmem:[%s1313_s26 + $0x320] sm:$0xff]  ;;  %v268_v51 = vld [vmem:[%s1313_s26 + $0x328] sm:$0xff] }
  0x47   : > { %217 = vst [vmem:[%s1318_s27 + $0xc8] sm:$0xff] %v216_v25  ;;  %v270_v52 = vld [vmem:[%s1313_s26 + $0x340] sm:$0xff]  ;;  %v272_v53 = vld [vmem:[%s1313_s26 + $0x348] sm:$0xff] }
  0x48   : > { %219 = vst [vmem:[%s1318_s27 + $0xd0] sm:$0xff] %v218_v26  ;;  %v274_v54 = vld [vmem:[%s1313_s26 + $0x360] sm:$0xff]  ;;  %v276_v55 = vld [vmem:[%s1313_s26 + $0x368] sm:$0xff] }
  0x49   : > { %221 = vst [vmem:[%s1318_s27 + $0xd8] sm:$0xff] %v220_v27  ;;  %v278_v56 = vld [vmem:[%s1313_s26 + $0x380] sm:$0xff]  ;;  %v280_v57 = vld [vmem:[%s1313_s26 + $0x388] sm:$0xff] }
  0x4a   : > { %223 = vst [vmem:[%s1318_s27 + $0xe0] sm:$0xff] %v222_v28  ;;  %v282_v58 = vld [vmem:[%s1313_s26 + $0x3a0] sm:$0xff]  ;;  %v284_v59 = vld [vmem:[%s1313_s26 + $0x3a8] sm:$0xff] }
  0x4b   : > { %225 = vst [vmem:[%s1318_s27 + $0xe8] sm:$0xff] %v224_v29  ;;  %v286_v60 = vld [vmem:[%s1313_s26 + $0x3c0] sm:$0xff]  ;;  %v288_v61 = vld [vmem:[%s1313_s26 + $0x3c8] sm:$0xff] }
  0x4c   : > { %227 = vst [vmem:[%s1318_s27 + $0xf0] sm:$0xff] %v226_v30  ;;  %v290_v62 = vld [vmem:[%s1313_s26 + $0x3e0] sm:$0xff]  ;;  %v292_v63 = vld [vmem:[%s1313_s26 + $0x3e8] sm:$0xff] }
  0x4d   : > { %229 = vst [vmem:[%s1318_s27 + $0xf8] sm:$0xff] %v228_v31  ;;  %v294_v0 = vld [vmem:[%s1313_s26 + $0x400] sm:$0xff]  ;;  %v296_v1 = vld [vmem:[%s1313_s26 + $0x408] sm:$0xff] }
  0x4e   : > { %231 = vst [vmem:[%s1318_s27 + $0x100] sm:$0xff] %v230_v32  ;;  %v298_v2 = vld [vmem:[%s1313_s26 + $0x420] sm:$0xff]  ;;  %v300_v3 = vld [vmem:[%s1313_s26 + $0x428] sm:$0xff] }
  0x4f   : > { %233 = vst [vmem:[%s1318_s27 + $0x108] sm:$0xff] %v232_v33  ;;  %v302_v4 = vld [vmem:[%s1313_s26 + $0x440] sm:$0xff]  ;;  %v304_v5 = vld [vmem:[%s1313_s26 + $0x448] sm:$0xff] }
  0x50   : > { %235 = vst [vmem:[%s1318_s27 + $0x110] sm:$0xff] %v234_v34  ;;  %v306_v6 = vld [vmem:[%s1313_s26 + $0x460] sm:$0xff]  ;;  %v308_v7 = vld [vmem:[%s1313_s26 + $0x468] sm:$0xff] }
  0x51   : > { %237 = vst [vmem:[%s1318_s27 + $0x118] sm:$0xff] %v236_v35  ;;  %v310_v8 = vld [vmem:[%s1313_s26 + $0x480] sm:$0xff]  ;;  %v312_v9 = vld [vmem:[%s1313_s26 + $0x488] sm:$0xff] }
  0x52   : > { %239 = vst [vmem:[%s1318_s27 + $0x120] sm:$0xff] %v238_v36  ;;  %v314_v10 = vld [vmem:[%s1313_s26 + $0x4a0] sm:$0xff]  ;;  %v316_v11 = vld [vmem:[%s1313_s26 + $0x4a8] sm:$0xff] }
  0x53   : > { %241 = vst [vmem:[%s1318_s27 + $0x128] sm:$0xff] %v240_v37  ;;  %v318_v12 = vld [vmem:[%s1313_s26 + $0x4c0] sm:$0xff]  ;;  %v320_v13 = vld [vmem:[%s1313_s26 + $0x4c8] sm:$0xff] }
  0x54   : > { %243 = vst [vmem:[%s1318_s27 + $0x130] sm:$0xff] %v242_v38  ;;  %v322_v14 = vld [vmem:[%s1313_s26 + $0x4e0] sm:$0xff]  ;;  %v324_v15 = vld [vmem:[%s1313_s26 + $0x4e8] sm:$0xff] }
  0x55   : > { %245 = vst [vmem:[%s1318_s27 + $0x138] sm:$0xff] %v244_v39  ;;  %v326_v16 = vld [vmem:[%s1313_s26 + $0x500] sm:$0xff]  ;;  %v328_v17 = vld [vmem:[%s1313_s26 + $0x508] sm:$0xff] }
  0x56   : > { %247 = vst [vmem:[%s1318_s27 + $0x140] sm:$0xff] %v246_v40  ;;  %v330_v18 = vld [vmem:[%s1313_s26 + $0x520] sm:$0xff]  ;;  %v332_v19 = vld [vmem:[%s1313_s26 + $0x528] sm:$0xff] }
  0x57   : > { %249 = vst [vmem:[%s1318_s27 + $0x148] sm:$0xff] %v248_v41  ;;  %v334_v20 = vld [vmem:[%s1313_s26 + $0x540] sm:$0xff]  ;;  %v336_v21 = vld [vmem:[%s1313_s26 + $0x548] sm:$0xff] }
  0x58   : > { %251 = vst [vmem:[%s1318_s27 + $0x150] sm:$0xff] %v250_v42  ;;  %v338_v22 = vld [vmem:[%s1313_s26 + $0x560] sm:$0xff]  ;;  %v340_v23 = vld [vmem:[%s1313_s26 + $0x568] sm:$0xff] }
  0x59   : > { %253 = vst [vmem:[%s1318_s27 + $0x158] sm:$0xff] %v252_v43  ;;  %v342_v24 = vld [vmem:[%s1313_s26 + $0x580] sm:$0xff]  ;;  %v344_v25 = vld [vmem:[%s1313_s26 + $0x588] sm:$0xff] }
  0x5a   : > { %255 = vst [vmem:[%s1318_s27 + $0x160] sm:$0xff] %v254_v44  ;;  %v346_v26 = vld [vmem:[%s1313_s26 + $0x5a0] sm:$0xff]  ;;  %v348_v27 = vld [vmem:[%s1313_s26 + $0x5a8] sm:$0xff] }
  0x5b   : > { %257 = vst [vmem:[%s1318_s27 + $0x168] sm:$0xff] %v256_v45  ;;  %v350_v28 = vld [vmem:[%s1313_s26 + $0x5c0] sm:$0xff]  ;;  %v352_v29 = vld [vmem:[%s1313_s26 + $0x5c8] sm:$0xff] }
  0x5c   : > { %259 = vst [vmem:[%s1318_s27 + $0x170] sm:$0xff] %v258_v46  ;;  %v354_v30 = vld [vmem:[%s1313_s26 + $0x5e0] sm:$0xff]  ;;  %v356_v31 = vld [vmem:[%s1313_s26 + $0x5e8] sm:$0xff] }
  0x5d   : > { %261 = vst [vmem:[%s1318_s27 + $0x178] sm:$0xff] %v260_v47  ;;  %v358_v32 = vld [vmem:[%s1313_s26 + $0x600] sm:$0xff]  ;;  %v360_v33 = vld [vmem:[%s1313_s26 + $0x608] sm:$0xff] }
  0x5e   : > { %263 = vst [vmem:[%s1318_s27 + $0x180] sm:$0xff] %v262_v48  ;;  %v362_v34 = vld [vmem:[%s1313_s26 + $0x620] sm:$0xff]  ;;  %v364_v35 = vld [vmem:[%s1313_s26 + $0x628] sm:$0xff] }
  0x5f   : > { %265 = vst [vmem:[%s1318_s27 + $0x188] sm:$0xff] %v264_v49  ;;  %v366_v36 = vld [vmem:[%s1313_s26 + $0x640] sm:$0xff]  ;;  %v368_v37 = vld [vmem:[%s1313_s26 + $0x648] sm:$0xff] }
  0x60   : > { %267 = vst [vmem:[%s1318_s27 + $0x190] sm:$0xff] %v266_v50  ;;  %v370_v38 = vld [vmem:[%s1313_s26 + $0x660] sm:$0xff]  ;;  %v372_v39 = vld [vmem:[%s1313_s26 + $0x668] sm:$0xff] }
  0x61   : > { %269 = vst [vmem:[%s1318_s27 + $0x198] sm:$0xff] %v268_v51  ;;  %v374_v40 = vld [vmem:[%s1313_s26 + $0x680] sm:$0xff]  ;;  %v376_v41 = vld [vmem:[%s1313_s26 + $0x688] sm:$0xff] }
  0x62   : > { %271 = vst [vmem:[%s1318_s27 + $0x1a0] sm:$0xff] %v270_v52  ;;  %v378_v42 = vld [vmem:[%s1313_s26 + $0x6a0] sm:$0xff]  ;;  %v380_v43 = vld [vmem:[%s1313_s26 + $0x6a8] sm:$0xff] }
  0x63   : > { %273 = vst [vmem:[%s1318_s27 + $0x1a8] sm:$0xff] %v272_v53 }
  0x64   : > { %275 = vst [vmem:[%s1318_s27 + $0x1b0] sm:$0xff] %v274_v54 }
  0x65   : > { %277 = vst [vmem:[%s1318_s27 + $0x1b8] sm:$0xff] %v276_v55 }
  0x66   : > { %279 = vst [vmem:[%s1318_s27 + $0x1c0] sm:$0xff] %v278_v56 }
  0x67   : > { %281 = vst [vmem:[%s1318_s27 + $0x1c8] sm:$0xff] %v280_v57 }
  0x68   : > { %283 = vst [vmem:[%s1318_s27 + $0x1d0] sm:$0xff] %v282_v58 }
  0x69   : > { %285 = vst [vmem:[%s1318_s27 + $0x1d8] sm:$0xff] %v284_v59 }
  0x6a   : > { %287 = vst [vmem:[%s1318_s27 + $0x1e0] sm:$0xff] %v286_v60 }
  0x6b   : > { %289 = vst [vmem:[%s1318_s27 + $0x1e8] sm:$0xff] %v288_v61 }
  0x6c   : > { %291 = vst [vmem:[%s1318_s27 + $0x1f0] sm:$0xff] %v290_v62 }
  0x6d   : > { %293 = vst [vmem:[%s1318_s27 + $0x1f8] sm:$0xff] %v292_v63 }
  0x6e   : > { %295 = vst [vmem:[%s1318_s27 + $0x200] sm:$0xff] %v294_v0 }
  0x6f   : > { %297 = vst [vmem:[%s1318_s27 + $0x208] sm:$0xff] %v296_v1 }
  0x70   : > { %299 = vst [vmem:[%s1318_s27 + $0x210] sm:$0xff] %v298_v2 }
  0x71   : > { %301 = vst [vmem:[%s1318_s27 + $0x218] sm:$0xff] %v300_v3 }
  0x72   : > { %303 = vst [vmem:[%s1318_s27 + $0x220] sm:$0xff] %v302_v4 }
  0x73   : > { %305 = vst [vmem:[%s1318_s27 + $0x228] sm:$0xff] %v304_v5 }
  0x74   : > { %307 = vst [vmem:[%s1318_s27 + $0x230] sm:$0xff] %v306_v6 }
  0x75   : > { %309 = vst [vmem:[%s1318_s27 + $0x238] sm:$0xff] %v308_v7 }
  0x76   : > { %311 = vst [vmem:[%s1318_s27 + $0x240] sm:$0xff] %v310_v8 }
  0x77   : > { %313 = vst [vmem:[%s1318_s27 + $0x248] sm:$0xff] %v312_v9 }
  0x78   : > { %315 = vst [vmem:[%s1318_s27 + $0x250] sm:$0xff] %v314_v10 }
  0x79   : > { %317 = vst [vmem:[%s1318_s27 + $0x258] sm:$0xff] %v316_v11 }
  0x7a   : > { %319 = vst [vmem:[%s1318_s27 + $0x260] sm:$0xff] %v318_v12 }
  0x7b   : > { %321 = vst [vmem:[%s1318_s27 + $0x268] sm:$0xff] %v320_v13 }
  0x7c   : > { %323 = vst [vmem:[%s1318_s27 + $0x270] sm:$0xff] %v322_v14 }
  0x7d   : > { %325 = vst [vmem:[%s1318_s27 + $0x278] sm:$0xff] %v324_v15 }
  0x7e   : > { %327 = vst [vmem:[%s1318_s27 + $0x280] sm:$0xff] %v326_v16 }
  0x7f   : > { %329 = vst [vmem:[%s1318_s27 + $0x288] sm:$0xff] %v328_v17 }
  0x80   : > { %331 = vst [vmem:[%s1318_s27 + $0x290] sm:$0xff] %v330_v18 }
  0x81   : > { %333 = vst [vmem:[%s1318_s27 + $0x298] sm:$0xff] %v332_v19 }
  0x82   : > { %335 = vst [vmem:[%s1318_s27 + $0x2a0] sm:$0xff] %v334_v20 }
  0x83   : > { %337 = vst [vmem:[%s1318_s27 + $0x2a8] sm:$0xff] %v336_v21 }
  0x84   : > { %339 = vst [vmem:[%s1318_s27 + $0x2b0] sm:$0xff] %v338_v22 }
  0x85   : > { %341 = vst [vmem:[%s1318_s27 + $0x2b8] sm:$0xff] %v340_v23 }
  0x86   : > { %343 = vst [vmem:[%s1318_s27 + $0x2c0] sm:$0xff] %v342_v24 }
  0x87   : > { %345 = vst [vmem:[%s1318_s27 + $0x2c8] sm:$0xff] %v344_v25 }
  0x88   : > { %347 = vst [vmem:[%s1318_s27 + $0x2d0] sm:$0xff] %v346_v26 }
  0x89   : > { %349 = vst [vmem:[%s1318_s27 + $0x2d8] sm:$0xff] %v348_v27 }
  0x8a   : > { %351 = vst [vmem:[%s1318_s27 + $0x2e0] sm:$0xff] %v350_v28 }
  0x8b   : > { %353 = vst [vmem:[%s1318_s27 + $0x2e8] sm:$0xff] %v352_v29 }
  0x8c   : > { %355 = vst [vmem:[%s1318_s27 + $0x2f0] sm:$0xff] %v354_v30 }
  0x8d   : > { %357 = vst [vmem:[%s1318_s27 + $0x2f8] sm:$0xff] %v356_v31 }
  0x8e   : > { %359 = vst [vmem:[%s1318_s27 + $0x300] sm:$0xff] %v358_v32 }
  0x8f   : > { %361 = vst [vmem:[%s1318_s27 + $0x308] sm:$0xff] %v360_v33 }
  0x90   : > { %363 = vst [vmem:[%s1318_s27 + $0x310] sm:$0xff] %v362_v34 }
  0x91   : > { %365 = vst [vmem:[%s1318_s27 + $0x318] sm:$0xff] %v364_v35 }
  0x92   : > { %367 = vst [vmem:[%s1318_s27 + $0x320] sm:$0xff] %v366_v36 }
  0x93   : > { %369 = vst [vmem:[%s1318_s27 + $0x328] sm:$0xff] %v368_v37 }
  0x94   : > { %371 = vst [vmem:[%s1318_s27 + $0x330] sm:$0xff] %v370_v38 }
  0x95   : > { %373 = vst [vmem:[%s1318_s27 + $0x338] sm:$0xff] %v372_v39 }
  0x96   : > { %375 = vst [vmem:[%s1318_s27 + $0x340] sm:$0xff] %v374_v40 }
  0x97   : > { %377 = vst [vmem:[%s1318_s27 + $0x348] sm:$0xff] %v376_v41 }
  0x98   : > { %379 = vst [vmem:[%s1318_s27 + $0x350] sm:$0xff] %v378_v42 }
  0x99   : > { %381 = vst [vmem:[%s1318_s27 + $0x358] sm:$0xff] %v380_v43 }
  0x9a PF: > { %p941_p13 = scmp.ge.s32.totalorder %s1170_s21, 1  ;;  %p386_p0 = scmp.lt.s32.totalorder %s1170_s21, 49 }
  0x9c   : > { %p387_p1 = pnand %p941_p13, %p386_p0 }
  0x9d   : > { %s393_s28 = sand.u32 (!%p387_p1), 1, %s1130_s11   ;;  %s410_s3 = sand.u32 (!%p387_p1), 1, %s1122_s9  }
  0x9e   : > { %390 = sbr.rel (%p387_p1) target bundleno = 417 (0x1a1), region = 47  ;;  %p942_p2 = scmp.ne.s32.totalorder (!%p387_p1), %s1138_s13, 0 }
  0x9f   : > { %s959_s30 = smul.u32 (!%p387_p1), 864, %s393_s28 }
  0xa0   : > { %s960_s7 = smul.u32 (!%p387_p1), 48, %s410_s3 }
  0xa1   : > { %s1537_s17 = scalar_lea.vmem (!%p387_p1), [#allocation3], %s959_s30 }
  0xa2   : > { %s1539_s26 = scalar_lea.vmem (!%p387_p1), [#allocation4], %s960_s7 }
  0xa3   : > { %419 = sbr.rel (%p942_p2) target bundleno = 175 (0xaf), region = 55 }
  0xa8   : > { %v1172_v44 = vmov 0.0  }
  0xa9   : > { %420 = vst [vmem:[#allocation2 + $0x28] sm:$0xff] %v1172_v44 }
  0xaa   : > { %421 = vst [vmem:[#allocation2 + $0x10] sm:$0xff] %v1172_v44 }
  0xab   : > { %422 = vst [vmem:[#allocation2 + $0x8] sm:$0xff] %v1172_v44 }
  0xac   : > { %423 = vst [vmem:[#allocation2] sm:$0xff] %v1172_v44 }
  0xad   : > { %424 = vst [vmem:[#allocation2 + $0x18] sm:$0xff] %v1172_v44 }
  0xae   : > { %425 = vst [vmem:[#allocation2 + $0x20] sm:$0xff] %v1172_v44 }
  0xaf PF: > { %v477_v45 = vld [vmem:[%s1537_s17 + $0xf0] sm:$0xff]  ;;  %v475_v47 = vld [vmem:[%s1537_s17 + $0xe0] sm:$0xff]  ;;  %v478_v17 = vld [vmem:[%s1537_s17 + $0xf8] sm:$0xff]  ;;  %s955_s9 = smul.u32 96, %s1138_s13  ;;  %vm555_vm0 = vcmask 392192   ;;  %p950_p3 = scmp.ne.s32.totalorder %s1138_s13, 2 }
  0xb0   : > { %v541_v46 = vld [vmem:[%s1537_s17 + $0x2f0] sm:$0xff]  ;;  %565 = vmatpush.msra.mxu0 %v477_v45  ;;  %v539_v49 = vld [vmem:[%s1537_s17 + $0x2e0] sm:$0xff]  ;;  %v476_v21 = vld [vmem:[%s1537_s17 + $0xe8] sm:$0xff] }
  0xb1   : > { %617 = vmatpush.msra.mxu2 %v541_v46  ;;  %v509_v48 = vld [vmem:[%s1537_s17 + $0x1f0] sm:$0xff]  ;;  %v507_v51 = vld [vmem:[%s1537_s17 + $0x1e0] sm:$0xff]  ;;  %v474_v25 = vld [vmem:[%s1537_s17 + $0xd8] sm:$0xff]  ;;  %s1593_s22 = scalar_lea.vmem %s1781_s1, %s955_s9 }
  0xb2   : > { %591 = vmatpush.msra.mxu1 %v509_v48  ;;  %v473_v50 = vld [vmem:[%s1537_s17 + $0xd0] sm:$0xff]  ;;  %566 = vmatpush.msra.mxu0 %v475_v47  ;;  %v471_v54 = vld [vmem:[%s1537_s17 + $0xc0] sm:$0xff]  ;;  %v472_v29 = vld [vmem:[%s1537_s17 + $0xc8] sm:$0xff] }
  0xb3   : > { %v537_v52 = vld [vmem:[%s1537_s17 + $0x2d0] sm:$0xff]  ;;  %618 = vmatpush.msra.mxu2 %v539_v49  ;;  %v535_v55 = vld [vmem:[%s1537_s17 + $0x2c0] sm:$0xff]  ;;  %v1601_v33 = vld [vmem:[%s1593_s22 + $0x18] sm:$0xff] }
  0xb4   : > { %v505_v53 = vld [vmem:[%s1537_s17 + $0x1d0] sm:$0xff]  ;;  %592 = vmatpush.msra.mxu1 %v507_v51  ;;  %567 = vmatpush.msra.mxu0 %v473_v50  ;;  %v503_v56 = vld [vmem:[%s1537_s17 + $0x1c0] sm:$0xff]  ;;  %v470_v37 = vld [vmem:[%s1537_s17 + $0xb8] sm:$0xff] }
  0xb5   : > { %619 = vmatpush.msra.mxu2 %v537_v52  ;;  %v469_v57 = vld [vmem:[%s1537_s17 + $0xb0] sm:$0xff]  ;;  %v467_v61 = vld [vmem:[%s1537_s17 + $0xa0] sm:$0xff]  ;;  %v510_v41 = vld [vmem:[%s1537_s17 + $0x1f8] sm:$0xff] }
  0xb6   : > { %593 = vmatpush.msra.mxu1 %v505_v53  ;;  %v533_v58 = vld [vmem:[%s1537_s17 + $0x2b0] sm:$0xff]  ;;  %568 = vmatpush.msra.mxu0 %v471_v54  ;;  %v531_v62 = vld [vmem:[%s1537_s17 + $0x2a0] sm:$0xff]  ;;  %v508_v44 = vld [vmem:[%s1537_s17 + $0x1e8] sm:$0xff] }
  0xb7   : > { %620 = vmatpush.msra.mxu2 %v535_v55  ;;  %v501_v59 = vld [vmem:[%s1537_s17 + $0x1b0] sm:$0xff]  ;;  %v499_v63 = vld [vmem:[%s1537_s17 + $0x1a0] sm:$0xff]  ;;  %v542_v45 = vld [vmem:[%s1537_s17 + $0x2f8] sm:$0xff] }
  0xb8   : > { %v553_v60 = vld [vmem:[%s1537_s17 + $0x350] sm:$0xff]  ;;  %594 = vmatpush.msra.mxu1 %v503_v56  ;;  %569 = vmatpush.msra.mxu0 %v469_v57  ;;  %v551_v0 = vld [vmem:[%s1537_s17 + $0x340] sm:$0xff]  ;;  %v1623_v46 = vld [vmem:[%s1593_s22 + $0x8] sm:$0xff] }
  0xb9   : > { %653 = vmatpush.msra.mxu3 %v553_v60  ;;  %621 = vmatpush.msra.mxu2 %v533_v58  ;;  %v465_v1 = vld [vmem:[%s1537_s17 + $0x90] sm:$0xff]  ;;  %v547_v5 = vld [vmem:[%s1537_s17 + $0x320] sm:$0xff]  ;;  %v468_v47 = vld [vmem:[%s1537_s17 + $0xa8] sm:$0xff] }
  0xba   : > { %595 = vmatpush.msra.mxu1 %v501_v59  ;;  %v529_v2 = vld [vmem:[%s1537_s17 + $0x290] sm:$0xff]  ;;  %570 = vmatpush.msra.mxu0 %v467_v61  ;;  %v463_v6 = vld [vmem:[%s1537_s17 + $0x80] sm:$0xff]  ;;  %v506_v48 = vld [vmem:[%s1537_s17 + $0x1d8] sm:$0xff] }
  0xbb   : > { %654 = vmatpush.msra.mxu3 %v551_v0  ;;  %v549_v3 = vld [vmem:[%s1537_s17 + $0x330] sm:$0xff]  ;;  %622 = vmatpush.msra.mxu2 %v531_v62  ;;  %v527_v7 = vld [vmem:[%s1537_s17 + $0x280] sm:$0xff]  ;;  %v540_v49 = vld [vmem:[%s1537_s17 + $0x2e8] sm:$0xff] }
  0xbc   : > { %v497_v4 = vld [vmem:[%s1537_s17 + $0x190] sm:$0xff]  ;;  %596 = vmatpush.msra.mxu1 %v499_v63  ;;  %571 = vmatpush.msra.mxu0 %v465_v1  ;;  %v495_v8 = vld [vmem:[%s1537_s17 + $0x180] sm:$0xff]  ;;  %v554_v50 = vld [vmem:[%s1537_s17 + $0x358] sm:$0xff] }
  0xbd   : > { %655 = vmatpush.msra.mxu3 %v549_v3  ;;  %623 = vmatpush.msra.mxu2 %v529_v2  ;;  %v545_v9 = vld [vmem:[%s1537_s17 + $0x310] sm:$0xff]  ;;  %v543_v13 = vld [vmem:[%s1537_s17 + $0x300] sm:$0xff]  ;;  %v466_v51 = vld [vmem:[%s1537_s17 + $0x98] sm:$0xff] }
  0xbe   : > { %597 = vmatpush.msra.mxu1 %v497_v4  ;;  %v461_v10 = vld [vmem:[%s1537_s17 + $0x70] sm:$0xff]  ;;  %572 = vmatpush.msra.mxu0 %v463_v6  ;;  %v459_v14 = vld [vmem:[%s1537_s17 + $0x60] sm:$0xff]  ;;  %v504_v52 = vld [vmem:[%s1537_s17 + $0x1c8] sm:$0xff] }
  0xbf   : > { %v525_v11 = vld [vmem:[%s1537_s17 + $0x270] sm:$0xff]  ;;  %656 = vmatpush.msra.mxu3 %v547_v5  ;;  %624 = vmatpush.msra.mxu2 %v527_v7  ;;  %v523_v15 = vld [vmem:[%s1537_s17 + $0x260] sm:$0xff]  ;;  %v538_v53 = vld [vmem:[%s1537_s17 + $0x2d8] sm:$0xff] }
  0xc0   : > { %v493_v12 = vld [vmem:[%s1537_s17 + $0x170] sm:$0xff]  ;;  %598 = vmatpush.msra.mxu1 %v495_v8  ;;  %573 = vmatpush.msra.mxu0 %v461_v10  ;;  %v491_v16 = vld [vmem:[%s1537_s17 + $0x160] sm:$0xff]  ;;  %v464_v54 = vld [vmem:[%s1537_s17 + $0x88] sm:$0xff] }
  0xc1   : > { %657 = vmatpush.msra.mxu3 %v545_v9  ;;  %625 = vmatpush.msra.mxu2 %v525_v11  ;;  %v457_v18 = vld [vmem:[%s1537_s17 + $0x50] sm:$0xff]  ;;  %v455_v22 = vld [vmem:[%s1537_s17 + $0x40] sm:$0xff]  ;;  %v552_v55 = vld [vmem:[%s1537_s17 + $0x348] sm:$0xff] }
  0xc2   : > { %599 = vmatpush.msra.mxu1 %v493_v12  ;;  %v521_v19 = vld [vmem:[%s1537_s17 + $0x250] sm:$0xff]  ;;  %574 = vmatpush.msra.mxu0 %v459_v14  ;;  %v519_v23 = vld [vmem:[%s1537_s17 + $0x240] sm:$0xff]  ;;  %v502_v57 = vld [vmem:[%s1537_s17 + $0x1b8] sm:$0xff] }
  0xc3   : > { %658 = vmatpush.msra.mxu3 %v543_v13  ;;  %626 = vmatpush.msra.mxu2 %v523_v15  ;;  %v489_v20 = vld [vmem:[%s1537_s17 + $0x150] sm:$0xff]  ;;  %v487_v24 = vld [vmem:[%s1537_s17 + $0x140] sm:$0xff]  ;;  %v536_v58 = vld [vmem:[%s1537_s17 + $0x2c8] sm:$0xff] }
  0xc4   : > { %600 = vmatpush.msra.mxu1 %v491_v16  ;;  %575 = vmatpush.msra.mxu0 %v457_v18  ;;  %v453_v26 = vld [vmem:[%s1537_s17 + $0x30] sm:$0xff]  ;;  %v451_v30 = vld [vmem:[%s1537_s17 + $0x20] sm:$0xff]  ;;  %v1642_v59 = vld [vmem:[%s1593_s22 + $0x38] sm:$0xff] }
  0xc5   : > { %669 = vmatpush.msrb.mxu3 %v478_v17  ;;  %627 = vmatpush.msra.mxu2 %v521_v19  ;;  %v517_v27 = vld [vmem:[%s1537_s17 + $0x230] sm:$0xff]  ;;  %v515_v31 = vld [vmem:[%s1537_s17 + $0x220] sm:$0xff]  ;;  %v462_v60 = vld [vmem:[%s1537_s17 + $0x78] sm:$0xff] }
  0xc6   : > { %601 = vmatpush.msra.mxu1 %v489_v20  ;;  %576 = vmatpush.msra.mxu0 %v455_v22  ;;  %v485_v28 = vld [vmem:[%s1537_s17 + $0x130] sm:$0xff]  ;;  %v483_v32 = vld [vmem:[%s1537_s17 + $0x120] sm:$0xff]  ;;  %v500_v61 = vld [vmem:[%s1537_s17 + $0x1a8] sm:$0xff] }
  0xc7   : > { %670 = vmatpush.msrb.mxu3 %v476_v21  ;;  %628 = vmatpush.msra.mxu2 %v519_v23  ;;  %v449_v34 = vld [vmem:[%s1537_s17 + $0x10] sm:$0xff]  ;;  %v447_v38 = vld [vmem:[%s1537_s17] sm:$0xff]  ;;  %v534_v62 = vld [vmem:[%s1537_s17 + $0x2b8] sm:$0xff] }
  0xc8   : > { %602 = vmatpush.msra.mxu1 %v487_v24  ;;  %577 = vmatpush.msra.mxu0 %v453_v26  ;;  %v513_v35 = vld [vmem:[%s1537_s17 + $0x210] sm:$0xff]  ;;  %v511_v39 = vld [vmem:[%s1537_s17 + $0x200] sm:$0xff]  ;;  %v1654_v0 = vld [vmem:[%s1593_s22 + $0x28] sm:$0xff] }
  0xc9   : > { %671 = vmatpush.msrb.mxu3 %v474_v25  ;;  %629 = vmatpush.msra.mxu2 %v517_v27  ;;  %v481_v36 = vld [vmem:[%s1537_s17 + $0x110] sm:$0xff]  ;;  %v1612_v40 = vld [vmem:[%s1593_s22 + $0x10] sm:$0xff]  ;;  %v460_v1 = vld [vmem:[%s1537_s17 + $0x68] sm:$0xff] }
  0xca   : > { %603 = vmatpush.msra.mxu1 %v485_v28  ;;  %578 = vmatpush.msra.mxu0 %v451_v30  ;;  %v479_v42 = vld [vmem:[%s1537_s17 + $0x100] sm:$0xff]  ;;  %v1617_v43 = vld [vmem:[%s1593_s22] sm:$0xff]  ;;  %v498_v2 = vld [vmem:[%s1537_s17 + $0x198] sm:$0xff] }
  0xcb   : > { %672 = vmatpush.msrb.mxu3 %v472_v29  ;;  %630 = vmatpush.msra.mxu2 %v515_v31  ;;  %v1637_v56 = vld [vmem:[%s1593_s22 + $0x30] sm:$0xff]  ;;  %v1649_v63 = vld [vmem:[%s1593_s22 + $0x20] sm:$0xff]  ;;  %v532_v3 = vld [vmem:[%s1537_s17 + $0x2a8] sm:$0xff] }
  0xcc   : > { %604 = vmatpush.msra.mxu1 %v483_v32  ;;  %944 = vmatmul.msk.f32.vlgmr.msra.gmra.mxu3 %vm555_vm0, %v1601_v33  ;;  %v550_v4 = vld [vmem:[%s1537_s17 + $0x338] sm:$0xff]  ;;  %v496_v6 = vld [vmem:[%s1537_s17 + $0x188] sm:$0xff]  ;;  %v1666_v8 = vld [vmem:[%s1593_s22 + $0x50] sm:$0xff] }
  0xcd   : > { %579 = vmatpush.msra.mxu0 %v449_v34  ;;  %631 = vmatpush.msra.mxu2 %v513_v35  ;;  %v458_v5 = vld [vmem:[%s1537_s17 + $0x58] sm:$0xff]  ;;  %v456_v9 = vld [vmem:[%s1537_s17 + $0x48] sm:$0xff]  ;;  %v443_v17 = vld [vmem:[%s1593_s22 + $0x40] sm:$0xff] }
  0xce   : > { %605 = vmatpush.msra.mxu1 %v481_v36  ;;  %673 = vmatpush.msrb.mxu3 %v470_v37  ;;  %v530_v7 = vld [vmem:[%s1537_s17 + $0x298] sm:$0xff]  ;;  %v528_v11 = vld [vmem:[%s1537_s17 + $0x288] sm:$0xff] }
  0xcf   : > { %580 = vmatpush.msra.mxu0 %v447_v38  ;;  %632 = vmatpush.msra.mxu2 %v511_v39  ;;  %v494_v10 = vld [vmem:[%s1537_s17 + $0x178] sm:$0xff]  ;;  %v1672_v12 = vld [vmem:[%s1593_s22 + $0x58] sm:$0xff] }
  0xd0   : > { %633 = vmatmul.f32.vlgmr.msra.gmra.mxu2 %v1612_v40  ;;  %606 = vmatpush.msra.mxu1 %v479_v42  ;;  %v548_v13 = vld [vmem:[%s1537_s17 + $0x328] sm:$0xff]  ;;  %v454_v14 = vld [vmem:[%s1537_s17 + $0x38] sm:$0xff] }
  0xd1   : > { %695 = vmatpush.msrb.mxu0 %v510_v41  ;;  %607 = vmatmul.f32.vlgmr.msra.gmra.mxu1 %v1623_v46  ;;  %v492_v15 = vld [vmem:[%s1537_s17 + $0x168] sm:$0xff]  ;;  %v526_v16 = vld [vmem:[%s1537_s17 + $0x278] sm:$0xff] }
  0xd2   : > { %581 = vmatmul.f32.vlgmr.msra.gmra.mxu0 %v1617_v43  ;;  %721 = vmatpush.msrb.mxu1 %v542_v45  ;;  %v444_v18 = vld [vmem:[%s1593_s22 + $0x48] sm:$0xff]  ;;  %v452_v19 = vld [vmem:[%s1537_s17 + $0x28] sm:$0xff] }
  0xd3   : > { %696 = vmatpush.msrb.mxu0 %v508_v44  ;;  %674 = vmatpush.msrb.mxu3 %v468_v47  ;;  %v490_v20 = vld [vmem:[%s1537_s17 + $0x158] sm:$0xff]  ;;  %v524_v21 = vld [vmem:[%s1537_s17 + $0x268] sm:$0xff] }
  0xd4   : > { %722 = vmatpush.msrb.mxu1 %v540_v49  ;;  %757 = vmatpush.msrb.mxu2 %v554_v50  ;;  %v546_v22 = vld [vmem:[%s1537_s17 + $0x318] sm:$0xff]  ;;  %v488_v24 = vld [vmem:[%s1537_s17 + $0x148] sm:$0xff] }
  0xd5   : > { %697 = vmatpush.msrb.mxu0 %v506_v48  ;;  %675 = vmatpush.msrb.mxu3 %v466_v51  ;;  %v450_v23 = vld [vmem:[%s1537_s17 + $0x18] sm:$0xff]  ;;  %v448_v26 = vld [vmem:[%s1537_s17 + $0x8] sm:$0xff] }
  0xd6   : > { %723 = vmatpush.msrb.mxu1 %v538_v53  ;;  %758 = vmatpush.msrb.mxu2 %v552_v55  ;;  %v522_v25 = vld [vmem:[%s1537_s17 + $0x258] sm:$0xff]  ;;  %v544_v27 = vld [vmem:[%s1537_s17 + $0x308] sm:$0xff] }
  0xd7   : > { %698 = vmatpush.msrb.mxu0 %v504_v52  ;;  %676 = vmatpush.msrb.mxu3 %v464_v54  ;;  %v486_v28 = vld [vmem:[%s1537_s17 + $0x138] sm:$0xff]  ;;  %v520_v29 = vld [vmem:[%s1537_s17 + $0x248] sm:$0xff] }
  0xd8   : > { %636 = vmatmul.f32.gmra.mxu2 %v1637_v56  ;;  %724 = vmatpush.msrb.mxu1 %v536_v58  ;;  %v484_v30 = vld [vmem:[%s1537_s17 + $0x128] sm:$0xff]  ;;  %v518_v31 = vld [vmem:[%s1537_s17 + $0x238] sm:$0xff] }
  0xd9   : > { %699 = vmatpush.msrb.mxu0 %v502_v57  ;;  %945 = vmatmul.msk.f32.gmra.mxu3 %vm555_vm0, %v1642_v59  ;;  %v482_v32 = vld [vmem:[%s1537_s17 + $0x118] sm:$0xff]  ;;  %v516_v34 = vld [vmem:[%s1537_s17 + $0x228] sm:$0xff] }
  0xda   : > { %677 = vmatpush.msrb.mxu3 %v462_v60  ;;  %725 = vmatpush.msrb.mxu1 %v534_v62  ;;  %v480_v35 = vld [vmem:[%s1537_s17 + $0x108] sm:$0xff]  ;;  %v514_v36 = vld [vmem:[%s1537_s17 + $0x218] sm:$0xff] }
  0xdb   : > { %700 = vmatpush.msrb.mxu0 %v500_v61  ;;  %610 = vmatmul.f32.gmra.mxu1 %v1654_v0  ;;  %v512_v37 = vld [vmem:[%s1537_s17 + $0x208] sm:$0xff]  ;;  %v428_v52 = vld [vmem:[#allocation2 + $0x8] sm:$0xff] }
  0xdc   : > { %584 = vmatmul.f32.gmra.mxu0 %v1649_v63  ;;  %678 = vmatpush.msrb.mxu3 %v460_v1  ;;  %v430_v61 = vld [vmem:[#allocation2 + $0x18] sm:$0xff] }
  0xdd   : > { %701 = vmatpush.msrb.mxu0 %v498_v2  ;;  %726 = vmatpush.msrb.mxu1 %v532_v3 }
  0xde   : > { %759 = vmatpush.msrb.mxu2 %v550_v4  ;;  %679 = vmatpush.msrb.mxu3 %v458_v5 }
  0xdf   : > { %702 = vmatpush.msrb.mxu0 %v496_v6  ;;  %727 = vmatpush.msrb.mxu1 %v530_v7  ;;  %v427_v6 = vld [vmem:[#allocation2 + $0x10] sm:$0xff] }
  0xe0   : > { %639 = vmatmul.f32.gmra.mxu2 %v1666_v8  ;;  %680 = vmatpush.msrb.mxu3 %v456_v9 }
  0xe1   : > { %703 = vmatpush.msrb.mxu0 %v494_v10  ;;  %728 = vmatpush.msrb.mxu1 %v528_v11 }
  0xe2   : > { %946 = vmatmul.msk.f32.gmra.mxu3 %vm555_vm0, %v1672_v12  ;;  %760 = vmatpush.msrb.mxu2 %v548_v13 }
  0xe3   : > { %681 = vmatpush.msrb.mxu3 %v454_v14  ;;  %704 = vmatpush.msrb.mxu0 %v492_v15  ;;  %v429_v15 = vld [vmem:[#allocation2] sm:$0xff] }
  0xe4   : > { %729 = vmatpush.msrb.mxu1 %v526_v16  ;;  %587 = vmatmul.f32.gmra.mxu0 %v443_v17 }
  0xe5   : > { %613 = vmatmul.f32.gmra.mxu1 %v444_v18  ;;  %682 = vmatpush.msrb.mxu3 %v452_v19 }
  0xe6   : > { %705 = vmatpush.msrb.mxu0 %v490_v20  ;;  %730 = vmatpush.msrb.mxu1 %v524_v21 }
  0xe7   : > { %761 = vmatpush.msrb.mxu2 %v546_v22  ;;  %683 = vmatpush.msrb.mxu3 %v450_v23 }
  0xe8   : > { %706 = vmatpush.msrb.mxu0 %v488_v24  ;;  %731 = vmatpush.msrb.mxu1 %v522_v25  ;;  %v431_v24 = vld [vmem:[#allocation2 + $0x20] sm:$0xff] }
  0xe9   : > { %684 = vmatpush.msrb.mxu3 %v448_v26  ;;  %762 = vmatpush.msrb.mxu2 %v544_v27 }
  0xea   : > { %707 = vmatpush.msrb.mxu0 %v486_v28  ;;  %732 = vmatpush.msrb.mxu1 %v520_v29 }
  0xeb   : > { %685 = vmatmul.f32.vlgmr.msrb.gmra.mxu3 %v1617_v43  ;;  %947 = vmatmul.msk.f32.vlgmr.msrb.gmra.mxu2 %vm555_vm0, %v1601_v33  ;;  %v426_v43 = vld [vmem:[#allocation2 + $0x28] sm:$0xff] }
  0xec   : > { %708 = vmatpush.msrb.mxu0 %v484_v30  ;;  %733 = vmatpush.msrb.mxu1 %v518_v31 }
  0xee   : > { %709 = vmatpush.msrb.mxu0 %v482_v32  ;;  %734 = vmatpush.msrb.mxu1 %v516_v34 }
  0xf0   : > { %710 = vmatpush.msrb.mxu0 %v480_v35  ;;  %735 = vmatpush.msrb.mxu1 %v514_v36 }
  0xf1   : > { %711 = vmatmul.f32.vlgmr.msrb.gmra.mxu0 %v1623_v46 }
  0xf2   : > { %736 = vmatpush.msrb.mxu1 %v512_v37 }
  0xf3   : > { %688 = vmatmul.f32.gmra.mxu3 %v1649_v63  ;;  %737 = vmatmul.f32.vlgmr.msrb.gmra.mxu1 %v1612_v40 }
  0xf4   : > { %948 = vmatmul.msk.f32.gmra.mxu2 %vm555_vm0, %v1642_v59 }
  0xf9   : > { %714 = vmatmul.f32.gmra.mxu0 %v1654_v0 }
  0xfb   : > { %691 = vmatmul.f32.gmra.mxu3 %v443_v17  ;;  %740 = vmatmul.f32.gmra.mxu1 %v1637_v56 }
  0xfc   : > { %949 = vmatmul.msk.f32.gmra.mxu2 %vm555_vm0, %v1672_v12 }
 0x101   : > { %717 = vmatmul.f32.gmra.mxu0 %v444_v18 }
 0x103   : > { %743 = vmatmul.f32.gmra.mxu1 %v1666_v8 }
 0x14e   : > { %v608_v38 = vpop.f32.mrf.mxu1 }
 0x14f   : > { %v582_v33 = vpop.f32.mrf.mxu0  ;;  %v660_v41 = vpop.f32.mrf.mxu3 }
 0x150   : > { %v609_v39 = vadd.f32 %v608_v38, %v582_v33 }
 0x153   : > { %v634_v42 = vpop.f32.mrf.mxu2 }
 0x154   : > { %v635_v40 = vadd.f32 %v634_v42, %v609_v39 }
 0x156   : > { %v661_v44 = vadd.f32 %v660_v41, %v635_v40 }
 0x158   : > { %v773_v45 = vadd.f32 %v661_v44, %v426_v43  ;;  %v611_v47 = vpop.f32.mrf.mxu1 }
 0x159   : > { %v585_v46 = vpop.f32.mrf.mxu0 }
 0x15a   : > { %779 = vst [vmem:[#allocation2 + $0x28] sm:$0xff] %v773_v45  ;;  %v612_v48 = vadd.f32 %v611_v47, %v585_v46 }
 0x15b   : > { %v637_v49 = vpop.f32.mrf.mxu2 }
 0x15c   : > { %v638_v50 = vadd.f32 %v637_v49, %v612_v48  ;;  %v663_v51 = vpop.f32.mrf.mxu3 }
 0x15e   : > { %v664_v53 = vadd.f32 %v663_v51, %v638_v50 }
 0x160   : > { %v775_v54 = vadd.f32 %v664_v53, %v428_v52 }
 0x161   : > { %v588_v55 = vpop.f32.mrf.mxu0 }
 0x162   : > { %781 = vst [vmem:[#allocation2 + $0x8] sm:$0xff] %v775_v54  ;;  %v614_v56 = vpop.f32.mrf.mxu1 }
 0x163   : > { %v615_v57 = vadd.f32 %v614_v56, %v588_v55  ;;  %v640_v58 = vpop.f32.mrf.mxu2 }
 0x165   : > { %v641_v59 = vadd.f32 %v640_v58, %v615_v57  ;;  %v666_v60 = vpop.f32.mrf.mxu3 }
 0x167   : > { %v667_v62 = vadd.f32 %v666_v60, %v641_v59 }
 0x169   : > { %v777_v63 = vadd.f32 %v667_v62, %v430_v61 }
 0x16b   : > { %783 = vst [vmem:[#allocation2 + $0x18] sm:$0xff] %v777_v63 }
 0x16e   : > { %v686_v0 = vpop.f32.mrf.mxu3  ;;  %v712_v1 = vpop.f32.mrf.mxu0 }
 0x16f   : > { %v713_v2 = vadd.f32 %v712_v1, %v686_v0  ;;  %v764_v3 = vpop.f32.mrf.mxu2 }
 0x170   : > { %v738_v4 = vpop.f32.mrf.mxu1 }
 0x171   : > { %v739_v5 = vadd.f32 %v738_v4, %v713_v2 }
 0x173   : > { %v765_v7 = vadd.f32 %v764_v3, %v739_v5 }
 0x175   : > { %v774_v8 = vadd.f32 %v765_v7, %v427_v6 }
 0x176   : > { %v689_v9 = vpop.f32.mrf.mxu3  ;;  %v715_v10 = vpop.f32.mrf.mxu0 }
 0x177   : > { %780 = vst [vmem:[#allocation2 + $0x10] sm:$0xff] %v774_v8  ;;  %v716_v11 = vadd.f32 %v715_v10, %v689_v9  ;;  %v767_v12 = vpop.f32.mrf.mxu2 }
 0x178   : > { %v741_v13 = vpop.f32.mrf.mxu1 }
 0x179   : > { %v742_v14 = vadd.f32 %v741_v13, %v716_v11 }
 0x17b   : > { %v768_v16 = vadd.f32 %v767_v12, %v742_v14 }
 0x17d   : > { %v776_v17 = vadd.f32 %v768_v16, %v429_v15 }
 0x17e   : > { %v692_v18 = vpop.f32.mrf.mxu3  ;;  %v718_v19 = vpop.f32.mrf.mxu0 }
 0x17f   : > { %782 = vst [vmem:[#allocation2] sm:$0xff] %v776_v17  ;;  %v719_v20 = vadd.f32 %v718_v19, %v692_v18  ;;  %v770_v22 = vpop.f32.mrf.mxu2 }
 0x180   : > { %v744_v21 = vpop.f32.mrf.mxu1 }
 0x181   : > { %v745_v23 = vadd.f32 %v744_v21, %v719_v20 }
 0x183   : > { %v771_v25 = vadd.f32 %v770_v22, %v745_v23  ;;  %788 = sbr.rel (%p950_p3) target bundleno = 400 (0x190), region = 59 }
 0x185   : > { %v778_v26 = vadd.f32 %v771_v25, %v431_v24 }
 0x187   : > { %784 = vst [vmem:[#allocation2 + $0x20] sm:$0xff] %v778_v26 }
 0x188   : > { %v789_v27 = vld [vmem:[#allocation2 + $0x28] sm:$0xff]  ;;  %v790_v28 = vld [vmem:[#allocation2 + $0x10] sm:$0xff]  ;;  %v792_v30 = vld [vmem:[#allocation2] sm:$0xff] }
 0x189   : > { %v791_v29 = vld [vmem:[#allocation2 + $0x8] sm:$0xff]  ;;  %795 = vst [vmem:[%s1539_s26] sm:$0xff] %v789_v27  ;;  %v793_v31 = vld [vmem:[#allocation2 + $0x18] sm:$0xff] }
 0x18a   : > { %796 = vst [vmem:[%s1539_s26 + $0x8] sm:$0xff] %v790_v28 }
 0x18b   : > { %797 = vst [vmem:[%s1539_s26 + $0x10] sm:$0xff] %v791_v29 }
 0x18c   : > { %798 = vst [vmem:[%s1539_s26 + $0x18] sm:$0xff] %v792_v30 }
 0x18d   : > { %799 = vst [vmem:[%s1539_s26 + $0x20] sm:$0xff] %v793_v31 }
 0x18e   : > { %v794_v32 = vld [vmem:[#allocation2 + $0x20] sm:$0xff] }
 0x18f   : > { %800 = vst [vmem:[%s1539_s26 + $0x28] sm:$0xff] %v794_v32 }
 0x190 PF: > { %807 = sbr.rel (!%p1285_p9) target bundleno = 417 (0x1a1), region = 63  ;;  %s1793_s13 = sld [smem:[#allocation5_spill]] (%p1285_p9)  ;;  %v827_v34 = vld [vmem:[%s1539_s26] sm:$0xff] (%p1285_p9) }
 0x191   : > { %s951_s5 = sshll.u32 (%p1285_p9), %s1142_s14, 1  ;;  %s961_s6 = smul.u32 (%p1285_p9), 12, %s1146_s15  ;;  %v829_v35 = vld [vmem:[%s1539_s26 + $0x8] sm:$0xff] (%p1285_p9) }
 0x192   : > { %s1794_s30 = sld [smem:[#allocation9_spill]] (%p1285_p9)  ;;  %v831_v36 = vld [vmem:[%s1539_s26 + $0x10] sm:$0xff] (%p1285_p9) }
 0x193   : > { %s810_s25 = sadd.s32 (%p1285_p9), %s961_s6, %s951_s5  ;;  %v833_v37 = vld [vmem:[%s1539_s26 + $0x18] sm:$0xff] (%p1285_p9) }
 0x194   : > { %v835_v33 = vld [vmem:[%s1539_s26 + $0x20] sm:$0xff] (%p1285_p9) }
 0x196   : > { %s962_s8 = smul.u32 48, %s1793_s13  ;;  %v837_v38 = vld [vmem:[%s1539_s26 + $0x28] sm:$0xff] }
 0x198   : > { %s812_s27 = sadd.s32 %s962_s8, %s810_s25 }
 0x199   : > { %s952_s28 = sshll.u32 %s812_s27, 3 }
 0x19a   : > { %s814_s7 = scalar_lea.vmem %s1794_s30, %s952_s28 }
 0x19b   : > { %828 = vst [vmem:[%s814_s7] sm:$0xff] %v827_v34 }
 0x19c   : > { %830 = vst [vmem:[%s814_s7 + $0x8] sm:$0xff] %v829_v35 }
 0x19d   : > { %832 = vst [vmem:[%s814_s7 + $0x20] sm:$0xff] %v831_v36 }
 0x19e   : > { %834 = vst [vmem:[%s814_s7 + $0x28] sm:$0xff] %v833_v37 }
 0x19f   : > { %836 = vst [vmem:[%s814_s7 + $0x40] sm:$0xff] %v835_v33 }
 0x1a0   : > { %838 = vst [vmem:[%s814_s7 + $0x48] sm:$0xff] %v837_v38 }
 0x1a1 PF: > { %s12_s21 = sadd.s32 1, %s1170_s21   ;;  %s1796_s13 = sld [smem:[#allocation6_spill]] }
 0x1a2   : > { %p1736_p4 = scmp.ge.s32.totalorder %s12_s21, 50   ;;  %s1797_s17 = sld [smem:[#allocation7_spill]] }
 0x1a3   : > { %s1798_s26 = sld [smem:[#allocation8_spill]]  ;;  %s1800_s9 = smov %s1126_s10 }
 0x1a4   : > { %s1801_s10 = smov %s1301_s29  ;;  %s1802_s11 = smov %s1134_s12 }
 0x1a5   : > { %s1803_s12 = smov %s1298_s16  ;;  %s1804_s14 = smov %s1158_s18 }
 0x1a6   : > { %s1805_s15 = smov %s1162_s19  ;;  %s1806_s16 = smov %s1166_s20 }
 0x1a7   : > { %s1807_s18 = smov %s1815_s23  ;;  %s1808_s19 = smov %s1819_s24 }
 0x1a8   :  { %11 = sbr.rel (!%p1736_p4) target bundleno = 9 (0x9), region = 118 }
 0x1a9   : > { %s1809_s20 = smov %s1798_s26 }

</bundles_post_ra>
